<compile_context>
chip_gen: v7x
topology: tpu7x:2x2x1
jax: 0.10.0
libtpu: 0.0.40
codegen_flags: <defaults>
</compile_context>

<pallas_src>
import functools

import jax
import jax.numpy as jnp
from jax.experimental import pallas as pl
from jax.experimental.pallas import tpu as pltpu


def _deconv_kernel(x_ref, w_ref, b_ref, o_ref, *, cin, use_mxu):
    """One (batch, spatial-tile) grid step.

    x_ref: (Cin, ts)      input pixels for this tile (channels on sublanes)
    w_ref: (4*Cout, Cin)  weight, rows ordered (ki, kj, oc), oc fastest
    b_ref: (4*Cout, 1)    bias replicated per (ki, kj), f32
    o_ref: (4*Cout, ts)   lane-dense output tile
    """
    if use_mxu:
        acc = jnp.dot(w_ref[...], x_ref[...], preferred_element_type=jnp.float32)
    else:
        # Cin is tiny: an unrolled broadcast-FMA on the VPU beats a <4%-utilized
        # MXU pass and keeps all arithmetic in f32 (v5e has no bf16 VPU).
        x = x_ref[...].astype(jnp.float32)
        w = w_ref[...].astype(jnp.float32)
        acc = w[:, 0:1] * x[0:1, :]
        for ic in range(1, cin):
            acc = acc + w[:, ic : ic + 1] * x[ic : ic + 1, :]
    o_ref[...] = (acc + b_ref[...]).astype(o_ref.dtype)


def upsample_deconv(x_nchw, weight, bias, *, ts_target=1024):
    """ConvTranspose2d(kernel_size=2, stride=2) forward, NCHW in / NCHW out.

    x_nchw: (N, Cin, H, W)
    weight: (Cin, Cout, 2, 2)   -- PyTorch ConvTranspose2d weight layout
    bias:   (Cout,)
    returns (N, Cout, 2H, 2W) in x_nchw.dtype
    """
    N, Cin, H, W = x_nchw.shape
    Cout = weight.shape[1]
    out_dtype = x_nchw.dtype
    HW = H * W

    # Small contraction dim -> f32 VPU path; otherwise bf16 MXU path
    # (f32 accumulation via preferred_element_type).
    use_mxu = Cin > 8
    compute_dtype = jnp.bfloat16 if use_mxu else x_nchw.dtype

    # (N, Cin, H, W) -> (N, Cin, H*W): free reshape, NO input transpose.
    x_flat = x_nchw.reshape(N, Cin, HW).astype(compute_dtype)

    # weight -> (4*Cout, Cin), row index = ki*2*Cout + kj*Cout + oc.
    w_t = jnp.transpose(weight, (2, 3, 1, 0)).reshape(4 * Cout, Cin)
    w_t = w_t.astype(compute_dtype)
    # bias -> (4*Cout, 1), replicated over (ki, kj); kept f32 for the add.
    b_col = jnp.tile(bias.astype(jnp.float32), 4).reshape(4 * Cout, 1)

    # Spatial tile: multiple of 128 lanes (unmasked stores), as large as
    # possible up to ts_target; pad H*W instead of asserting divisibility.
    ts = max(128, (ts_target // 128) * 128)
    ts = min(ts, 128 * pl.cdiv(HW, 128))
    hw_pad = ts * pl.cdiv(HW, ts)
    if hw_pad != HW:
        x_flat = jnp.pad(x_flat, ((0, 0), (0, 0), (0, hw_pad - HW)))

    grid = (N, hw_pad // ts)
    kernel = functools.partial(_deconv_kernel, cin=Cin, use_mxu=use_mxu)

    # Per-step VMEM: ~2*(Cin + 4*Cout)*ts*4B (double-buffered x/out) + weight.
    # Tiny here; for large Cin/Cout re-derive ts per generation (v7x has only
    # 64 MiB VMEM) and add a K grid axis with an f32 accumulator scratch if the
    # (4*Cout, Cin) weight block itself gets large.
    out_flat = pl.pallas_call(
        kernel,
        out_shape=jax.ShapeDtypeStruct((N, 4 * Cout, hw_pad), out_dtype),
        grid_spec=pltpu.PrefetchScalarGridSpec(
            num_scalar_prefetch=0,
            grid=grid,
            in_specs=[
                pl.BlockSpec((None, Cin, ts), lambda n, s: (n, 0, s)),
                # Weight/bias blocks are grid-invariant (constant index_map),
                # so they are fetched once and stay resident.
                pl.BlockSpec((4 * Cout, Cin), lambda n, s: (0, 0)),
                pl.BlockSpec((4 * Cout, 1), lambda n, s: (0, 0)),
            ],
            out_specs=pl.BlockSpec((None, 4 * Cout, ts), lambda n, s: (n, 0, s)),
        ),
        compiler_params=pltpu.CompilerParams(
            dimension_semantics=("parallel", "parallel"),
            vmem_limit_bytes=32 * 1024 * 1024,
        ),
    )(x_flat, w_t, b_col)

    # Crop spatial padding; rows split as (ki, kj, oc), columns as (i, j).
    out = out_flat[:, :, :HW].reshape(N, 2, 2, Cout, H, W)
    # Single XLA transpose to honor the module's NCHW contract:
    # (n, ki, kj, oc, i, j) -> (n, oc, i, ki, j, kj) -> (N, Cout, 2H, 2W).
    out = jnp.transpose(out, (0, 3, 4, 1, 5, 2)).reshape(N, Cout, 2 * H, 2 * W)
    return out


def _reference_deconv(x_nchw, weight, bias):
    # Pure-JAX reference of ConvTranspose2d(k=2, s=2) for validation.
    N, Cin, H, W = x_nchw.shape
    Cout = weight.shape[1]
    y = jnp.einsum(
        "nchw,cokl->nohkwl", x_nchw, weight, precision=jax.lax.Precision.HIGHEST
    )  # (N, Cout, H, 2, W, 2)
    y = y.reshape(N, Cout, 2 * H, 2 * W)
    return y + bias[None, :, None, None]


if __name__ == "__main__":
    key = jax.random.PRNGKey(0)
    k_x, k_w, k_b, k_x2, k_w2, k_b2 = jax.random.split(key, 6)

    # Case 1: the module's implied small shape (Cin=4 -> f32 VPU path).
    N, Cin, Cout, H, W = 2, 4, 8, 16, 16
    x = jax.random.normal(k_x, (N, Cin, H, W), dtype=jnp.float32)
    weight = jax.random.normal(k_w, (Cin, Cout, 2, 2), dtype=jnp.float32) * 0.1
    bias = jax.random.normal(k_b, (Cout,), dtype=jnp.float32) * 0.1

    out = jax.block_until_ready(upsample_deconv(x, weight, bias))
    ref = _reference_deconv(x, weight, bias)
    assert out.shape == (N, Cout, 2 * H, 2 * W), out.shape
    assert jnp.allclose(out, ref, atol=1e-4, rtol=1e-4), "mismatch (f32/VPU path)"

    # Case 2: larger Cin exercises the bf16 MXU path (and spatial padding).
    N2, Cin2, Cout2, H2, W2 = 2, 32, 16, 8, 8
    x2 = jax.random.normal(k_x2, (N2, Cin2, H2, W2), dtype=jnp.float32)
    weight2 = jax.random.normal(k_w2, (Cin2, Cout2, 2, 2), dtype=jnp.float32) * 0.1
    bias2 = jax.random.normal(k_b2, (Cout2,), dtype=jnp.float32) * 0.1

    out2 = jax.block_until_ready(upsample_deconv(x2, weight2, bias2))
    # Reference on bf16-rounded operands (the kernel feeds bf16 into the MXU
    # with f32 accumulation).
    ref2 = _reference_deconv(
        x2.astype(jnp.bfloat16).astype(jnp.float32),
        weight2.astype(jnp.bfloat16).astype(jnp.float32),
        bias2,
    )
    assert out2.shape == (N2, Cout2, 2 * H2, 2 * W2), out2.shape
    assert jnp.allclose(out2, ref2, atol=2e-3, rtol=2e-3), "mismatch (bf16/MXU path)"

    print("KERNEL_OK")
</pallas_src>

<mosaic_0001>
module attributes {stable_mosaic.version = 11 : i64} {
  func.func @_deconv_kernel(%arg0: i32, %arg1: i32, %arg2: memref<1x4x256xf32, #tpu.memory_space<vmem>>, %arg3: memref<32x4xf32, #tpu.memory_space<vmem>>, %arg4: memref<32x1xf32, #tpu.memory_space<vmem>>, %arg5: memref<1x32x256xf32, #tpu.memory_space<vmem>>) attributes {dimension_semantics = [#tpu.dimension_semantics<parallel>, #tpu.dimension_semantics<parallel>], iteration_bounds = array<i64: 2, 1>, scalar_prefetch = 0 : i64, scratch_operands = 0 : i64, tpu.core_type = #tpu.core_type<tc>, window_params = [{transform_indices = @transform_0, window_bounds = array<i64: 1, 4, 256>}, {pipeline_mode = #tpu.pipeline_mode<synchronous>, transform_indices = @transform_1, window_bounds = array<i64: 32, 4>}, {pipeline_mode = #tpu.pipeline_mode<synchronous>, transform_indices = @transform_2, window_bounds = array<i64: 32, 1>}, {transform_indices = @transform_3, window_bounds = array<i64: 1, 32, 256>}]} {
    %c0 = arith.constant 0 : index
    %c0_0 = arith.constant 0 : index
    %c0_1 = arith.constant 0 : index
    %0 = vector.load %arg2[%c0, %c0_0, %c0_1] : memref<1x4x256xf32, #tpu.memory_space<vmem>>, vector<1x4x256xf32>
    %1 = vector.shape_cast %0 : vector<1x4x256xf32> to vector<4x256xf32>
    %c0_2 = arith.constant 0 : index
    %c0_3 = arith.constant 0 : index
    %2 = vector.load %arg3[%c0_2, %c0_3] : memref<32x4xf32, #tpu.memory_space<vmem>>, vector<32x4xf32>
    %3 = vector.extract_strided_slice %2 {offsets = [0, 0], sizes = [32, 1], strides = [1, 1]} : vector<32x4xf32> to vector<32x1xf32>
    %4 = vector.extract_strided_slice %1 {offsets = [0, 0], sizes = [1, 256], strides = [1, 1]} : vector<4x256xf32> to vector<1x256xf32>
    %5 = vector.broadcast %3 : vector<32x1xf32> to vector<32x256xf32>
    %6 = vector.broadcast %4 : vector<1x256xf32> to vector<32x256xf32>
    %7 = arith.mulf %5, %6 : vector<32x256xf32>
    %8 = vector.extract_strided_slice %2 {offsets = [0, 1], sizes = [32, 1], strides = [1, 1]} : vector<32x4xf32> to vector<32x1xf32>
    %9 = vector.extract_strided_slice %1 {offsets = [1, 0], sizes = [1, 256], strides = [1, 1]} : vector<4x256xf32> to vector<1x256xf32>
    %10 = vector.broadcast %8 : vector<32x1xf32> to vector<32x256xf32>
    %11 = vector.broadcast %9 : vector<1x256xf32> to vector<32x256xf32>
    %12 = arith.mulf %10, %11 : vector<32x256xf32>
    %13 = arith.addf %7, %12 : vector<32x256xf32>
    %14 = vector.extract_strided_slice %2 {offsets = [0, 2], sizes = [32, 1], strides = [1, 1]} : vector<32x4xf32> to vector<32x1xf32>
    %15 = vector.extract_strided_slice %1 {offsets = [2, 0], sizes = [1, 256], strides = [1, 1]} : vector<4x256xf32> to vector<1x256xf32>
    %16 = vector.broadcast %14 : vector<32x1xf32> to vector<32x256xf32>
    %17 = vector.broadcast %15 : vector<1x256xf32> to vector<32x256xf32>
    %18 = arith.mulf %16, %17 : vector<32x256xf32>
    %19 = arith.addf %13, %18 : vector<32x256xf32>
    %20 = vector.extract_strided_slice %2 {offsets = [0, 3], sizes = [32, 1], strides = [1, 1]} : vector<32x4xf32> to vector<32x1xf32>
    %21 = vector.extract_strided_slice %1 {offsets = [3, 0], sizes = [1, 256], strides = [1, 1]} : vector<4x256xf32> to vector<1x256xf32>
    %22 = vector.broadcast %20 : vector<32x1xf32> to vector<32x256xf32>
    %23 = vector.broadcast %21 : vector<1x256xf32> to vector<32x256xf32>
    %24 = arith.mulf %22, %23 : vector<32x256xf32>
    %25 = arith.addf %19, %24 : vector<32x256xf32>
    %c0_4 = arith.constant 0 : index
    %c0_5 = arith.constant 0 : index
    %26 = vector.load %arg4[%c0_4, %c0_5] : memref<32x1xf32, #tpu.memory_space<vmem>>, vector<32x1xf32>
    %27 = vector.broadcast %26 : vector<32x1xf32> to vector<32x256xf32>
    %28 = arith.addf %25, %27 : vector<32x256xf32>
    %c0_6 = arith.constant 0 : index
    %c0_7 = arith.constant 0 : index
    %c0_8 = arith.constant 0 : index
    %29 = vector.load %arg5[%c0_6, %c0_7, %c0_8] : memref<1x32x256xf32, #tpu.memory_space<vmem>>, vector<1x32x256xf32>
    %30 = vector.shape_cast %29 : vector<1x32x256xf32> to vector<32x256xf32>
    %31 = vector.shape_cast %28 : vector<32x256xf32> to vector<1x32x256xf32>
    tpu.vector_store %arg5[%c0_6, %c0_7, %c0_8], %31 {strides = array<i32>} : memref<1x32x256xf32, #tpu.memory_space<vmem>>, vector<1x32x256xf32>,
    return
  }
  func.func @transform_0(%arg0: i32, %arg1: i32) -> (i32, i32, i32) {
    %c0_i32 = arith.constant 0 : i32
    %c0_i32_0 = arith.constant 0 : i32
    return %arg0, %c0_i32, %arg1 : i32, i32, i32
  }
  func.func @transform_1(%arg0: i32, %arg1: i32) -> (i32, i32) {
    %c0_i32 = arith.constant 0 : i32
    %c0_i32_0 = arith.constant 0 : i32
    %c0_i32_1 = arith.constant 0 : i32
    return %c0_i32, %c0_i32_0 : i32, i32
  }
  func.func @transform_2(%arg0: i32, %arg1: i32) -> (i32, i32) {
    %c0_i32 = arith.constant 0 : i32
    %c0_i32_0 = arith.constant 0 : i32
    %c0_i32_1 = arith.constant 0 : i32
    return %c0_i32, %c0_i32_0 : i32, i32
  }
  func.func @transform_3(%arg0: i32, %arg1: i32) -> (i32, i32, i32) {
    %c0_i32 = arith.constant 0 : i32
    %c0_i32_0 = arith.constant 0 : i32
    return %arg0, %c0_i32, %arg1 : i32, i32, i32
  }
}

</mosaic_0001>

<bundles_post_ra>
// kernel: tpu_custom_call.1
= control target key start
LH: loop header
LB: loop body
LE: loop exit
PB: predicated region body
PF: predicated region fallthrough
CT: control target
= control target key end

     0   :  { %8 = vsyncpa [#allocation3], 0  ;;  %s896_s0 = inlined_call_operand.vmem [shape: f32[2,4,256], index: 0, kind: input, shape index: {}]   ;;  %s897_s1 = inlined_call_operand.vmem [shape: f32[32,4], index: 1, kind: input, shape index: {}]   ;;  %s898_s2 = inlined_call_operand.vmem [shape: f32[32,1], index: 2, kind: input, shape index: {}]   ;;  %s899_s3 = inlined_call_operand.hbm [shape: f32[2,32,256], index: 3, kind: output, shape index: {}]  }
   0x1   :  { %10 = vsyncpa [#allocation3 + $0x1], 0  ;;  %s730_s12 = smov 0   ;;  %s732_s13 = smov 0  }
   0x2   :  { %s734_s14 = smov 0   ;;  %s736_s15 = smov 0  }
   0x3   :  { %s738_s16 = smov 0   ;;  %s740_s17 = smov 0  }
   0x4 LB: > { %s537_s18 = sadd.s32 4294967295, %s701_s17   ;;  %s538_s19 = sadd.s32 4294967294, %s701_s17   ;;  %s701_s17 = sphi %s740_s17, %s16_s17   ;;  %s697_s16 = sphi %s738_s16, %s906_s16   ;;  %s693_s15 = sphi %s736_s15, %s905_s15   ;;  %s689_s14 = sphi %s734_s14, %s904_s14   ;;  %s685_s13 = sphi %s732_s13, %s903_s13   ;;  %s681_s12 = sphi %s730_s12, %s902_s12  }
   0x5   : > { %s28_s20 = sadd.s32 1, %s697_s16  ;;  %s107_s21 = sadd.s32 1, %s689_s14 }
   0x6   : > { %p30_p0 = scmp.ge.s32.totalorder %s28_s20, 2  ;;  %p117_p1 = scmp.ne.s32.totalorder %s689_s14, %s685_s13 }
   0x7   : > { %p118_p2 = scmp.eq.s32.totalorder %s537_s18, 1  ;;  %p123_p3 = scmp.ne.s32.totalorder %s685_s13, %s681_s12 }
   0x8   : > { %s908_s20 = smov (%p30_p0, %s28_s20), 0  ;;  %p124_p5 = scmp.eq.s32.totalorder %s538_s19, 1 }
   0x9   : > { %p770_p4 = por %p118_p2, %p117_p1  ;;  %s102_s23 = ssub.s32 %s697_s16, %s908_s20 }
   0xa   : > { %p541_p6 = scmp.ge.s32.totalorder %s701_s17, 1  ;;  %p105_p7 = scmp.eq.s32.totalorder %s102_s23, 0 }
   0xb   : > { %p777_p8 = por %p124_p5, %p123_p3  ;;  %p161_p9 = scmp.lt.s32.totalorder %s701_s17, 3 }
   0xc   : > { %s783_s25 = scalar_select %p105_p7, %s689_s14, %s107_s21  }
   0xd   : > { %p162_p10 = pnand %p541_p6, %p161_p9 }
   0xe   : > { %v203_v0 = vld [vmem:[%s897_s1 + $0x10] sm:$0xff] (!%p162_p10)  ;;  %v201_v1 = vld [vmem:[%s897_s1] sm:$0xff] (!%p162_p10)  ;;  %v703_v2 = vmov (!%p162_p10), 0   ;;  %v204_v3 = vld [vmem:[%s897_s1 + $0x18] sm:$0xff] (!%p162_p10)  ;;  %v704_v5 = vmov (!%p162_p10), 1   ;;  %v705_v6 = vmov (!%p162_p10), 2   ;;  %v226_v16 = vlaneseq (!%p162_p10) }
   0xf   : > { %165 = sbr.rel (%p162_p10) target bundleno = 209 (0xd1), region = 32  ;;  %614 = vset.pattern.permute.xlu1 (!%p162_p10), %v703_v2  ;;  %613 = vset.pattern.permute.xlu0 (!%p162_p10), %v703_v2  ;;  %v202_v4 = vld [vmem:[%s897_s1 + $0x8] sm:$0xff] (!%p162_p10)  ;;  %v706_v7 = vmov (!%p162_p10), 3   ;;  %v402_v9 = vld [vmem:[%s898_s2] sm:$0xff] (!%p162_p10)  ;;  %v404_v10 = vld [vmem:[%s898_s2 + $0x10] sm:$0xff] (!%p162_p10)  ;;  %p190_p11 = scmp.lt.s32.totalorder (!%p162_p10), %s693_s15, 1 }
  0x10   : > { %217 = vperm.xlu1 (!%p162_p10), %614, %v203_v0   ;;  %207 = vperm.xlu0 (!%p162_p10), %613, %v201_v1   ;;  %v403_v8 = vld [vmem:[%s898_s2 + $0x8] sm:$0xff] (!%p162_p10)  ;;  %v405_v11 = vld [vmem:[%s898_s2 + $0x18] sm:$0xff] (!%p162_p10)  ;;  %v227_v19 = vshrl.u32 (!%p162_p10), %v226_v16, 7  ;;  %s186_s30 = sand.u32 (!%p162_p10), 1, %s685_s13   ;;  %s551_s6 = sshll.u32 (!%p162_p10), %s693_s15, 10 }
  0x11   : > { %s542_s4 = sshll.u32 (!%p162_p10), %s186_s30, 6  ;;  %s842_s10 = scalar_lea.hbm (!%p162_p10), %s899_s3, %s551_s6 }
  0x12   : > { %v270_v22 = vsub.s32 (!%p162_p10), 1, %v227_v19  ;;  %v274_v23 = vsub.s32 (!%p162_p10), 5, %v227_v19  ;;  %v228_v24 = vsub.s32 (!%p162_p10), 0, %v227_v19  ;;  %v232_v25 = vsub.s32 (!%p162_p10), 4, %v227_v19  ;;  %s829_s5 = scalar_lea.vmem (!%p162_p10), [#allocation2], %s542_s4  ;;  %s707_s18 = smov (!%p162_p10), [#allocation2]  }
  0x13   : > { %v320_v26 = vsub.s32 (!%p162_p10), 2, %v227_v19  ;;  %v324_v27 = vsub.s32 (!%p162_p10), 6, %v227_v19  ;;  %v370_v37 = vsub.s32 (!%p162_p10), 3, %v227_v19  ;;  %v374_v38 = vsub.s32 (!%p162_p10), 7, %v227_v19  ;;  %s458_s7 = sshll.u32 (!%p162_p10), %s829_s5, 4  ;;  %s627_s19 = sshll.u32 (!%p162_p10), %s707_s18, 4  ;;  %s844_s7 = int_to_ptr.vmem [resolvable:$true] %s458_s7  ;;  %s628_s19 = int_to_ptr.vmem [resolvable:$false] %s627_s19 }
  0x14   : > { %222 = vperm.xlu1 (!%p162_p10), %614, %v204_v3   ;;  %212 = vperm.xlu0 (!%p162_p10), %613, %v202_v4   ;;  %s623_s11 = scalar_lea.vmem (!%p162_p10), %s844_s7, 1024  ;;  %s629_s21 = scalar_lea.vmem (!%p162_p10), %s628_s19, 2048 }
  0x15   : > { %p624_p12 = scmp.ne.s32.totalorder (!%p162_p10), %s844_s7, %s623_s11  ;;  %p630_p1 = scmp.lt.s32.totalorder (!%p162_p10), %s844_s7, %s628_s19 }
  0x16   : > { %s191_s23 = scalar_select %p190_p11, %s693_s15, 1 }
  0x17   : > { %s850_s15 = scalar_lea.sflag [#allocation3], %s186_s30  ;;  %p625_p13 = pnand %p624_p12, %p770_p4 }
  0x18   : > { %616 = vset.pattern.permute.xlu1 %v704_v5  ;;  %615 = vset.pattern.permute.xlu0 %v704_v5  ;;  %s550_s26 = sshll.u32 %s191_s23, 3  ;;  %p631_p2 = scmp.lt.s32.totalorder %s629_s21, %s623_s11 }
  0x19   : > { %257 = vperm.xlu1 %616, %v202_v4   ;;  %253 = vperm.xlu0 %615, %v201_v1   ;;  %s197_s29 = scalar_lea.vmem %s896_s0, %s550_s26  ;;  %p626_p0 = pneg %p625_p13 }
  0x1a   : > { %v200_v28 = vld [vmem:[%s197_s29] sm:$0xff]  ;;  %p632_p3 = por %p631_p2, %p630_p1 }
  0x1b   : > { %v271_v29 = vrot.slane %v200_v28, %v270_v22  ;;  %v275_v30 = vrot.slane %v200_v28, %v274_v23  ;;  %v229_v33 = vrot.slane %v200_v28, %v228_v24  ;;  %v233_v34 = vrot.slane %v200_v28, %v232_v25 }
  0x1c   : > { %v321_v35 = vrot.slane %v200_v28, %v320_v26  ;;  %v325_v36 = vrot.slane %v200_v28, %v324_v27  ;;  %v371_v47 = vrot.slane %v200_v28, %v370_v37  ;;  %v375_v48 = vrot.slane %v200_v28, %v374_v38  ;;  %p633_p5 = pnand %p632_p3, %p626_p0 }
  0x1d   : > { %261 = vperm.xlu1 %616, %v203_v0   ;;  %265 = vperm.xlu0 %615, %v204_v3   ;;  %v281_v39 = vrot.slane %v271_v29, %v270_v22  ;;  %v285_v40 = vrot.slane %v275_v30, %v270_v22  ;;  %v239_v43 = vrot.slane %v229_v33, %v228_v24 }
  0x1e   : > { %v243_v44 = vrot.slane %v233_v34, %v228_v24  ;;  %v331_v45 = vrot.slane %v321_v35, %v320_v26  ;;  %v335_v46 = vrot.slane %v325_v36, %v320_v26  ;;  %v381_v63 = vrot.slane %v371_v47, %v370_v37 }
  0x21   : > { %617 = vset.pattern.permute.xlu1 %v705_v6  ;;  %618 = vset.pattern.permute.xlu0 %v705_v6 }
  0x22   : > { %303 = vperm.xlu1 %617, %v201_v1   ;;  %307 = vperm.xlu0 %618, %v202_v4  }
  0x26   : > { %311 = vperm.xlu1 %617, %v203_v0   ;;  %619 = vset.pattern.permute.xlu0 %v706_v7 }
  0x27   : > { %353 = vperm.xlu0 %619, %v201_v1  }
  0x2a   : > { %315 = vperm.xlu1 %617, %v204_v3  }
  0x2b   : > { %365 = vperm.xlu0 %619, %v204_v3  }
  0x2e   : > { %620 = vset.pattern.permute.xlu1 %v706_v7 }
  0x2f   : > { %357 = vperm.xlu1 %620, %v202_v4   ;;  %622 = vset.pattern.permute.xlu0 %v703_v2 }
  0x30   : > { %413 = vperm.xlu0 %622, %v403_v8  }
  0x33   : > { %361 = vperm.xlu1 %620, %v203_v0   ;;  %v385_v0 = vrot.slane %v375_v48, %v370_v37 }
  0x37   : > { %621 = vset.pattern.permute.xlu1 %v703_v2 }
  0x38   : > { %408 = vperm.xlu1 %621, %v402_v9  }
  0x3c   : > { %418 = vperm.xlu1 %621, %v404_v10  }
  0x40   : > { %423 = vperm.xlu1 %621, %v405_v11  }
  0x8f   : > { %v809_v12 = vpop.permute.xlu1 %217  ;;  %v208_v13 = vpop.permute.xlu0 %207 }
  0x90   : > { %v244_v54 = vmul.f32 %v239_v43, %v208_v13  ;;  %v245_v55 = vmul.f32 %v243_v44, %v208_v13  ;;  %v248_v19 = vmul.f32 %v239_v43, %v809_v12  ;;  %v249_v22 = vmul.f32 %v243_v44, %v809_v12 }
  0x93   : > { %v812_v14 = vpop.permute.xlu1 %222  ;;  %v213_v15 = vpop.permute.xlu0 %212 }
  0x94   : > { %v246_v49 = vmul.f32 %v239_v43, %v213_v15  ;;  %v247_v50 = vmul.f32 %v243_v44, %v213_v15  ;;  %v251_v30 = vmul.f32 %v243_v44, %v812_v14 }
  0x98   : > { %v258_v17 = vpop.permute.xlu1 %257  ;;  %v254_v18 = vpop.permute.xlu0 %253 }
  0x99   : > { %v288_v51 = vmul.f32 %v281_v39, %v258_v17  ;;  %v289_v52 = vmul.f32 %v285_v40, %v258_v17  ;;  %v286_v56 = vmul.f32 %v281_v39, %v254_v18  ;;  %v287_v57 = vmul.f32 %v285_v40, %v254_v18 }
  0x9b   : > { %v296_v61 = vadd.f32 %v288_v51, %v246_v49  ;;  %v297_v62 = vadd.f32 %v289_v52, %v247_v50  ;;  %v294_v1 = vadd.f32 %v286_v56, %v244_v54  ;;  %v295_v2 = vadd.f32 %v287_v57, %v245_v55 }
  0x9c   : > { %v262_v20 = vpop.permute.xlu1 %261  ;;  %v815_v21 = vpop.permute.xlu0 %265 }
  0x9d   : > { %v290_v10 = vmul.f32 %v281_v39, %v262_v20  ;;  %v291_v11 = vmul.f32 %v285_v40, %v262_v20  ;;  %v292_v23 = vmul.f32 %v281_v39, %v815_v21  ;;  %v293_v24 = vmul.f32 %v285_v40, %v815_v21 }
  0x9e   : > { %v250_v20 = vmul.f32 %v239_v43, %v812_v14 }
  0x9f   : > { %v298_v33 = vadd.f32 %v290_v10, %v248_v19  ;;  %v299_v34 = vadd.f32 %v291_v11, %v249_v22  ;;  %v301_v14 = vadd.f32 %v293_v24, %v251_v30 }
  0xa0   : > { %v300_v39 = vadd.f32 %v292_v23, %v250_v20 }
  0xa1   : > { %v304_v31 = vpop.permute.xlu1 %303  ;;  %v308_v32 = vpop.permute.xlu0 %307 }
  0xa2   : > { %v338_v58 = vmul.f32 %v331_v45, %v308_v32  ;;  %v339_v59 = vmul.f32 %v335_v46, %v308_v32  ;;  %v336_v3 = vmul.f32 %v331_v45, %v304_v31  ;;  %v337_v4 = vmul.f32 %v335_v46, %v304_v31 }
  0xa4   : > { %v346_v6 = vadd.f32 %v338_v58, %v296_v61  ;;  %v347_v7 = vadd.f32 %v339_v59, %v297_v62  ;;  %v344_v26 = vadd.f32 %v336_v3, %v294_v1  ;;  %v345_v27 = vadd.f32 %v337_v4, %v295_v2 }
  0xa5   : > { %v312_v41 = vpop.permute.xlu1 %311 }
  0xa6   : > { %v354_v42 = vpop.permute.xlu0 %353  ;;  %v340_v31 = vmul.f32 %v331_v45, %v312_v41  ;;  %v341_v32 = vmul.f32 %v335_v46, %v312_v41 }
  0xa7   : > { %v386_v15 = vmul.f32 %v381_v63, %v354_v42  ;;  %v387_v16 = vmul.f32 %v385_v0, %v354_v42 }
  0xa8   : > { %v348_v41 = vadd.f32 %v340_v31, %v298_v33  ;;  %v349_v42 = vadd.f32 %v341_v32, %v299_v34 }
  0xa9   : > { %v316_v53 = vpop.permute.xlu1 %315  ;;  %v394_v12 = vadd.f32 %v386_v15, %v344_v26  ;;  %v395_v21 = vadd.f32 %v387_v16, %v345_v27 }
  0xaa   : > { %v366_v60 = vpop.permute.xlu0 %365  ;;  %v342_v35 = vmul.f32 %v331_v45, %v316_v53  ;;  %v343_v36 = vmul.f32 %v335_v46, %v316_v53 }
  0xab   : > { %v392_v47 = vmul.f32 %v381_v63, %v366_v60  ;;  %v393_v48 = vmul.f32 %v385_v0, %v366_v60 }
  0xac   : > { %v350_v49 = vadd.f32 %v342_v35, %v300_v39  ;;  %v351_v50 = vadd.f32 %v343_v36, %v301_v14 }
  0xae   : > { %v358_v5 = vpop.permute.xlu1 %357  ;;  %v400_v54 = vadd.f32 %v392_v47, %v350_v49  ;;  %v401_v55 = vadd.f32 %v393_v48, %v351_v50 }
  0xaf   : > { %v388_v8 = vmul.f32 %v381_v63, %v358_v5  ;;  %v389_v9 = vmul.f32 %v385_v0, %v358_v5  ;;  %v414_v13 = vpop.permute.xlu0 %413 }
  0xb1   : > { %v396_v17 = vadd.f32 %v388_v8, %v346_v6  ;;  %v397_v18 = vadd.f32 %v389_v9, %v347_v7 }
  0xb2   : > { %v362_v25 = vpop.permute.xlu1 %361 }
  0xb3   : > { %v428_v28 = vadd.f32 %v414_v13, %v396_v17  ;;  %v429_v29 = vadd.f32 %v414_v13, %v397_v18  ;;  %v390_v37 = vmul.f32 %v381_v63, %v362_v25  ;;  %v391_v38 = vmul.f32 %v385_v0, %v362_v25 }
  0xb5   : > { %436 = vst [vmem:[%s829_s5 + $0x10] sm:$0xff] %v428_v28  ;;  %437 = vst [vmem:[%s829_s5 + $0x18] sm:$0xff] %v429_v29  ;;  %v398_v45 = vadd.f32 %v390_v37, %v348_v41  ;;  %v399_v46 = vadd.f32 %v391_v38, %v349_v42 }
  0xb7   : > { %v409_v40 = vpop.permute.xlu1 %408 }
  0xb8   : > { %v426_v43 = vadd.f32 %v409_v40, %v394_v12  ;;  %v427_v44 = vadd.f32 %v409_v40, %v395_v21 }
  0xba   : > { %434 = vst [vmem:[%s829_s5] sm:$0xff] %v426_v43  ;;  %435 = vst [vmem:[%s829_s5 + $0x8] sm:$0xff] %v427_v44 }
  0xbb   : > { %v419_v51 = vpop.permute.xlu1 %418 }
  0xbc   : > { %v430_v52 = vadd.f32 %v419_v51, %v398_v45  ;;  %v431_v53 = vadd.f32 %v419_v51, %v399_v46 }
  0xbe   : > { %438 = vst [vmem:[%s829_s5 + $0x20] sm:$0xff] %v430_v52  ;;  %439 = vst [vmem:[%s829_s5 + $0x28] sm:$0xff] %v431_v53 }
  0xbf   : > { %v424_v56 = vpop.permute.xlu1 %423 }
  0xc0   : > { %v432_v57 = vadd.f32 %v424_v56, %v400_v54  ;;  %v433_v58 = vadd.f32 %v424_v56, %v401_v55 }
  0xc2   : > { %440 = vst [vmem:[%s829_s5 + $0x30] sm:$0xff] %v432_v57  ;;  %441 = vst [vmem:[%s829_s5 + $0x38] sm:$0xff] %v433_v58 }
  0xc3   : > { %636 = shalt.err (!%p633_p5)
}
  0xc4   : > { %s637_s23 = scalar_lea.hbm %s842_s10, 1024  ;;  %s641_s28 = scalar_lea.hbm %s899_s3, 2048 }
  0xc5   : > { %p638_p6 = scmp.ne.s32.totalorder %s842_s10, %s637_s23  ;;  %p642_p10 = scmp.lt.u32.totalorder %s842_s10, %s899_s3 }
  0xc6   : > { %p643_p11 = scmp.lt.u32.totalorder %s641_s28, %s637_s23  ;;  %p645_p13 = scmp.lt.u32.totalorder %s637_s23, %s842_s10 }
  0xc7   : > { %p639_p7 = pnand %p638_p6, %p770_p4 }
  0xc8   : > { %p644_p12 = por %p643_p11, %p642_p10 }
  0xc9   : > { %p640_p9 = pneg %p639_p7 }
  0xca   : > { %p646_p0 = por %p645_p13, %p644_p12 }
  0xcc   : > { %p647_p1 = pnand %p646_p0, %p640_p9 }
  0xce   : > { %650 = shalt.err (!%p647_p1)
}
  0xcf   : > { %s708_s4 = smov 256   ;;  %s709_s5 = smov 16  }
  0xd0   : > { %552 = dma.vmem_to_hbm [thread:$0]  (%p770_p4), %s844_s7, 1024, %s842_s10, %s850_s15, %s708_s4, %s708_s4, %s709_s5  }
  0xd1 PF: > { %p558_p2 = scmp.ge.s32.totalorder %s701_s17, 2  ;;  %s473_s6 = sand.u32 1, %s681_s12  }
  0xd2   : > { %s474_s8 = scalar_lea.sflag [#allocation3], %s473_s6 }
  0xd3   : > { %p555_p3 = pnand %p558_p2, %p777_p8 }
  0xd5   : > { %676 = dma.done.wait (!%p555_p3), %s474_s8, 1024  }
  0xd6   : > { %678 = vsyncadd (!%p555_p3), %s474_s8, 4294966272  ;;  %s16_s17 = sadd.s32 1, %s701_s17   ;;  %s902_s12 = smov %s685_s13 }
  0xd7   : > { %p13_p5 = scmp.ge.s32.totalorder %s16_s17, 4   ;;  %s903_s13 = smov %s689_s14 }
  0xd8   : > { %s904_s14 = smov %s783_s25  ;;  %s905_s15 = smov %s697_s16 }
  0xd9   : > { %s906_s16 = smov %s908_s20  ;;  %15 = sbr.rel (!%p13_p5) target bundleno = 4 (0x4), region = 67 }
  0xe0   :  { %479 = vsyncpa [#allocation3], 1 }
  0xe1   :  { %481 = vsyncpa [#allocation3 + $0x1], 1 }

</bundles_post_ra>
